<compile_context>
chip_gen: v6e
topology: v6e:2x2x1
jax: 0.10.0
libtpu: 0.0.40
codegen_flags: <defaults>
</compile_context>

<pallas_src>
import functools

import numpy as np
import jax
import jax.numpy as jnp
from jax.experimental import pallas as pl
from jax.experimental.pallas import tpu as pltpu


def _round_up(x, m):
    return (x + m - 1) // m * m


def _build_conv_tap_index(block_size, h2, cp):
    """Static int32 map T[bs*bs, 4*cp]: T[k, col] = flat conv-weight index (c*9+a*3+b)
    with which image pixel k contributes to output column col, or 27 (sentinel -> 0).

    Column layout: col = (p*2+q)*cp + c*h2*h2 + i*h2 + j  -- one lane-aligned chunk of
    width `cp` per 2x2-pool position (p,q); inside a chunk the ordering is exactly
    PyTorch's Flatten(start_dim=1) order of the pooled (3, h2, h2) map."""
    bs = block_size
    F = h2 * h2
    T = np.full((bs * bs, 4 * cp), 27, dtype=np.int32)
    for p in range(2):
        for q in range(2):
            for c in range(3):
                for i in range(h2):
                    for j in range(h2):
                        col = (p * 2 + q) * cp + c * F + i * h2 + j
                        for a in range(3):
                            for b in range(3):
                                y = 2 * i + p + a - 1
                                x = 2 * j + q + b - 1
                                if 0 <= y < bs and 0 <= x < bs:
                                    T[y * bs + x, col] = c * 9 + a * 3 + b
    return T


# ----------------------------------------------------------------------------
# Fused kernel: conv(3x3,pad=1) + ELU + maxpool(2,2) + flatten + MLP + gates.
# ----------------------------------------------------------------------------
def _fused_kernel(x_ref, el_ref, er_ref, m_ref, bconv_ref, w1a_ref, w1b_ref,
                  w1f_ref, b1_ref, w2_ref, b2_ref, out_ref, *, emb, cp):
    # x_ref:  (tn, bs*bs) f32 raw image rows (lane-dense)
    # m_ref:  (bs*bs, 4*cp) bf16 conv-as-matmul matrix (resident)
    # bconv_ref: (1, cp) f32 per-lane conv bias (0 in pad lanes)
    # w1a/w1b: (E, H) f32, w1f: (cp, H) bf16, b1: (1, H) f32
    # w2: (H, 3E) f32, b2: (1, 3E) f32
    xb = x_ref[...].astype(jnp.bfloat16)

    # Conv for all 3 channels at each of the 4 positions of every 2x2 pool window:
    # one K=bs*bs, N=cp bf16 MXU matmul per position; max-reduce across positions.
    pooled = None
    for k in range(4):
        pre = jnp.dot(xb, m_ref[:, k * cp:(k + 1) * cp],
                      preferred_element_type=jnp.float32)
        pooled = pre if pooled is None else jnp.maximum(pooled, pre)

    # Conv bias and ELU once, after the max (both commute with the 2x2 max).  The clamp
    # keeps the unselected ELU branch finite (exact expm1 not guaranteed in Mosaic).
    pooled = pooled + bconv_ref[...]
    feat = jnp.where(pooled > 0.0, pooled,
                     jnp.exp(jnp.minimum(pooled, 0.0)) - 1.0)

    el = el_ref[...]
    er = er_ref[...]

    # First Linear, K-split over [el | er | conv features] (no HBM concat).  Only the
    # conv-feature dot carries real MXU weight -> bf16; the E-wide dots stay f32.
    h = jnp.dot(el, w1a_ref[...], preferred_element_type=jnp.float32)
    h = h + jnp.dot(er, w1b_ref[...], preferred_element_type=jnp.float32)
    h = h + jnp.dot(feat.astype(jnp.bfloat16), w1f_ref[...],
                    preferred_element_type=jnp.float32)
    h = jnp.maximum(h + b1_ref[...], 0.0)                 # ReLU hidden activation
    o = jnp.dot(h, w2_ref[...], preferred_element_type=jnp.float32) + b2_ref[...]

    embedding = o[:, 0:emb]
    mem_overwrite_ratio = o[:, emb:2 * emb]
    embedding_ratio = o[:, 2 * emb:3 * emb]

    # TODO(synk): `weighted_average` is not shown in the source module; assumed to be a
    # sigmoid-gated convex combination: w_avg(a, b, r) = sigmoid(r)*a + (1-sigmoid(r))*b.
    g1 = jax.nn.sigmoid(embedding_ratio)
    weighted_prev = g1 * el + (1.0 - g1) * er
    g2 = jax.nn.sigmoid(mem_overwrite_ratio)
    # TODO(synk): output last dim is E (<128 lanes) -> masked stores; per review this is
    # a small fraction of the tile, so not worth lane-packing.
    out_ref[...] = g2 * weighted_prev + (1.0 - g2) * embedding


# ----------------------------------------------------------------------------
# Forward pass wrapper.
# ----------------------------------------------------------------------------
def conv_edge_encoder_forward(diagonal_x, embedding_l, embedding_r, params,
                              *, embedding_size, block_size, row_tile=2048):
    wc, bc, w1, b1, w2, b2 = params

    was_reshaped = diagonal_x.ndim == 5
    if was_reshaped:
        bsz, blocks_in_batch = diagonal_x.shape[:2]
        diagonal_x = diagonal_x.reshape(bsz * blocks_in_batch, *diagonal_x.shape[2:])
    N = diagonal_x.shape[0]

    # TODO(synk): odd block_size (PyTorch MaxPool2d floor-truncation) not handled.
    assert block_size % 2 == 0
    bs = block_size
    h2 = bs // 2
    F = h2 * h2
    F3 = 3 * F
    cp = max(128, _round_up(F3, 128))    # lane-aligned pooled-feature chunk width
    E = embedding_size
    H = w1.shape[1]

    # edge_size is 1 by construction: the module probes conv_out_shape with a 1-channel
    # tensor, so Conv2d(edge_size, 3, ...) only works when edge_size == 1.
    x = diagonal_x[..., 0].reshape(N, bs * bs).astype(jnp.float32)   # raw rows
    el = embedding_l.reshape(-1, E).astype(jnp.float32)
    er = embedding_r.reshape(-1, E).astype(jnp.float32)

    # Build the conv-as-matmul matrix (bs*bs, 4*cp) from the 27 conv weights with a
    # static tap-index gather (weight index 27 -> 0).  Resident in VMEM, tiny.
    T = _build_conv_tap_index(bs, h2, cp)
    wc_ext = jnp.concatenate([wc.astype(jnp.float32), jnp.zeros((1,), jnp.float32)])
    conv_mat = wc_ext[T].astype(jnp.bfloat16)                        # (bs*bs, 4*cp)

    bias_idx = np.full((cp,), 3, dtype=np.int32)
    bias_idx[:F3] = np.repeat(np.arange(3, dtype=np.int32), F)
    bc_ext = jnp.concatenate([bc.astype(jnp.float32), jnp.zeros((1,), jnp.float32)])
    bconv = bc_ext[bias_idx][None, :]                                # (1, cp)

    w1a = w1[0:E].astype(jnp.float32)                                # (E, H)
    w1b = w1[E:2 * E].astype(jnp.float32)                            # (E, H)
    w1f = jnp.pad(w1[2 * E:2 * E + F3],
                  ((0, cp - F3), (0, 0))).astype(jnp.bfloat16)       # (cp, H)
    b1f = b1.reshape(1, H).astype(jnp.float32)
    w2f = w2.astype(jnp.float32)                                     # (H, 3E)
    b2f = b2.reshape(1, 3 * E).astype(jnp.float32)

    # Row tiling: large tiles amortize the per-grid-step overhead; keep >=2 grid steps
    # when there is enough work so both v7x TensorCores get a share.  At row_tile=2048
    # total VMEM (inputs double-buffered + intermediates + resident weights) is ~20 MiB,
    # comfortably under the 48 MiB limit on v5e/v6e/v7x.
    n8 = _round_up(max(N, 1), 8)
    grid_n = -(-n8 // row_tile)
    if n8 >= 16:
        grid_n = max(grid_n, 2)
    tn = _round_up(-(-n8 // grid_n), 8)
    n_pad = tn * grid_n
    if n_pad != N:
        pad = n_pad - N
        x = jnp.pad(x, ((0, pad), (0, 0)))
        el = jnp.pad(el, ((0, pad), (0, 0)))
        er = jnp.pad(er, ((0, pad), (0, 0)))

    out = pl.pallas_call(
        functools.partial(_fused_kernel, emb=E, cp=cp),
        out_shape=jax.ShapeDtypeStruct((n_pad, E), jnp.float32),
        grid=(grid_n,),
        in_specs=[
            pl.BlockSpec((tn, bs * bs), lambda i: (i, 0)),       # raw image rows
            pl.BlockSpec((tn, E), lambda i: (i, 0)),             # embedding_l
            pl.BlockSpec((tn, E), lambda i: (i, 0)),             # embedding_r
            pl.BlockSpec((bs * bs, 4 * cp), lambda i: (0, 0)),   # conv matrix (resident)
            pl.BlockSpec((1, cp), lambda i: (0, 0)),             # conv bias lanes
            pl.BlockSpec((E, H), lambda i: (0, 0)),              # W1[:E]
            pl.BlockSpec((E, H), lambda i: (0, 0)),              # W1[E:2E]
            pl.BlockSpec((cp, H), lambda i: (0, 0)),             # W1 conv-feature rows
            pl.BlockSpec((1, H), lambda i: (0, 0)),              # b1
            pl.BlockSpec((H, 3 * E), lambda i: (0, 0)),          # W2
            pl.BlockSpec((1, 3 * E), lambda i: (0, 0)),          # b2
        ],
        out_specs=pl.BlockSpec((tn, E), lambda i: (i, 0)),
        compiler_params=pltpu.CompilerParams(
            # TODO(synk): per the perf review, confirm the 2-TC split on v7x in xprof;
            # switch to pltpu.CORE_PARALLEL if one TensorCore stays idle.
            dimension_semantics=("parallel",),
            vmem_limit_bytes=48 * 1024 * 1024),
    )(x, el, er, conv_mat, bconv, w1a, w1b, w1f, b1f, w2f, b2f)

    out = out[:N]
    if was_reshaped:
        out = out.reshape(bsz, blocks_in_batch, embedding_size)
    return out


# ----------------------------------------------------------------------------
# Pure-JAX reference (mirrors the PyTorch forward) for a correctness check.
# ----------------------------------------------------------------------------
def reference_forward(diagonal_x, embedding_l, embedding_r, params,
                      *, embedding_size, block_size):
    wc, bc, w1, b1, w2, b2 = params
    was_reshaped = diagonal_x.ndim == 5
    if was_reshaped:
        bsz, blocks = diagonal_x.shape[:2]
        diagonal_x = diagonal_x.reshape(bsz * blocks, *diagonal_x.shape[2:])
    N = diagonal_x.shape[0]
    h2 = block_size // 2

    x = diagonal_x[..., 0]
    xpad = jnp.pad(x, ((0, 0), (1, 1), (1, 1)))
    W = wc.reshape(3, 3, 3)
    chans = []
    for c in range(3):
        acc = jnp.full((N, block_size, block_size), bc[c], jnp.float32)
        for a in range(3):
            for b in range(3):
                acc = acc + W[c, a, b] * xpad[:, a:a + block_size, b:b + block_size]
        chans.append(acc)
    conv = jnp.stack(chans, axis=1)                          # (N, 3, bs, bs)
    elu = jnp.where(conv > 0, conv, jnp.expm1(conv))
    pooled = elu.reshape(N, 3, h2, 2, h2, 2).max(axis=(3, 5))
    feat = pooled.reshape(N, 3 * h2 * h2)

    el = embedding_l.reshape(-1, embedding_size)
    er = embedding_r.reshape(-1, embedding_size)
    xcat = jnp.concatenate([el, er, feat], axis=-1)
    h = jnp.maximum(jnp.dot(xcat, w1, precision=jax.lax.Precision.HIGHEST) + b1, 0.0)
    o = jnp.dot(h, w2, precision=jax.lax.Precision.HIGHEST) + b2
    emb = o[:, :embedding_size]
    mor = o[:, embedding_size:2 * embedding_size]
    ratio = o[:, 2 * embedding_size:]
    g1 = jax.nn.sigmoid(ratio)
    wprev = g1 * el + (1.0 - g1) * er
    g2 = jax.nn.sigmoid(mor)
    out = g2 * wprev + (1.0 - g2) * emb
    if was_reshaped:
        out = out.reshape(bsz, blocks, embedding_size)
    return out


# ----------------------------------------------------------------------------
# Deterministic parameter init (PyTorch-default-style uniform bounds).
# ----------------------------------------------------------------------------
def init_params(key, *, embedding_size, block_size, hidden):
    h2 = block_size // 2
    conv_out = 3 * h2 * h2
    linear_in = 2 * embedding_size + conv_out
    ks = jax.random.split(key, 6)

    def uinit(k, shape, fan_in):
        bound = 1.0 / float(fan_in) ** 0.5
        return jax.random.uniform(k, shape, jnp.float32, -bound, bound)

    wc = uinit(ks[0], (27,), 9)                         # Conv2d(1,3,3): flat c*9 + a*3 + b
    bc = uinit(ks[1], (3,), 9)
    w1 = uinit(ks[2], (linear_in, hidden), linear_in)   # Linear stored (in, out)
    b1 = uinit(ks[3], (1, hidden), linear_in)
    w2 = uinit(ks[4], (hidden, 3 * embedding_size), hidden)
    b2 = uinit(ks[5], (1, 3 * embedding_size), hidden)
    return wc, bc, w1, b1, w2, b2


if __name__ == "__main__":
    # Small, module-consistent shapes.
    B, S = 2, 4               # batch, blocks_in_batch (5-D diagonal_x path)
    block_size = 16
    edge_size = 1
    embedding_size = 32
    hidden = 64               # encoder_hidden_layer_sizes = [64]

    key = jax.random.PRNGKey(0)
    k_x, k_l, k_r, k_p = jax.random.split(key, 4)

    diagonal_x = jax.random.normal(
        k_x, (B, S, block_size, block_size, edge_size), jnp.float32)
    embedding_l = jax.random.normal(k_l, (B, S, embedding_size), jnp.float32)
    embedding_r = jax.random.normal(k_r, (B, S, embedding_size), jnp.float32)

    params = init_params(k_p, embedding_size=embedding_size,
                         block_size=block_size, hidden=hidden)

    fwd = jax.jit(functools.partial(conv_edge_encoder_forward,
                                    embedding_size=embedding_size,
                                    block_size=block_size))
    out = jax.block_until_ready(fwd(diagonal_x, embedding_l, embedding_r, params))

    assert out.shape == (B, S, embedding_size), out.shape
    assert bool(jnp.all(jnp.isfinite(out)))

    ref = reference_forward(diagonal_x, embedding_l, embedding_r, params,
                            embedding_size=embedding_size, block_size=block_size)
    max_err = float(jnp.max(jnp.abs(out - ref)))
    assert max_err < 5e-2, f"max abs err vs reference: {max_err}"
    print("KERNEL_OK")
</pallas_src>

<mosaic_0001>
module attributes {stable_mosaic.version = 11 : i64} {
  func.func @_fused_kernel(%arg0: i32, %arg1: memref<8x256xf32, #tpu.memory_space<vmem>>, %arg2: memref<8x32xf32, #tpu.memory_space<vmem>>, %arg3: memref<8x32xf32, #tpu.memory_space<vmem>>, %arg4: memref<256x1024xbf16, #tpu.memory_space<vmem>>, %arg5: memref<1x256xf32, #tpu.memory_space<vmem>>, %arg6: memref<32x64xf32, #tpu.memory_space<vmem>>, %arg7: memref<32x64xf32, #tpu.memory_space<vmem>>, %arg8: memref<256x64xbf16, #tpu.memory_space<vmem>>, %arg9: memref<1x64xf32, #tpu.memory_space<vmem>>, %arg10: memref<64x96xf32, #tpu.memory_space<vmem>>, %arg11: memref<1x96xf32, #tpu.memory_space<vmem>>, %arg12: memref<8x32xf32, #tpu.memory_space<vmem>>) attributes {dimension_semantics = [#tpu.dimension_semantics<parallel>], iteration_bounds = array<i64: 1>, scalar_prefetch = 0 : i64, scratch_operands = 0 : i64, tpu.core_type = #tpu.core_type<tc>, window_params = [{transform_indices = @transform_0, window_bounds = array<i64: 8, 256>}, {transform_indices = @transform_1, window_bounds = array<i64: 8, 32>}, {transform_indices = @transform_2, window_bounds = array<i64: 8, 32>}, {pipeline_mode = #tpu.pipeline_mode<synchronous>, transform_indices = @transform_3, window_bounds = array<i64: 256, 1024>}, {pipeline_mode = #tpu.pipeline_mode<synchronous>, transform_indices = @transform_4, window_bounds = array<i64: 1, 256>}, {pipeline_mode = #tpu.pipeline_mode<synchronous>, transform_indices = @transform_5, window_bounds = array<i64: 32, 64>}, {pipeline_mode = #tpu.pipeline_mode<synchronous>, transform_indices = @transform_6, window_bounds = array<i64: 32, 64>}, {pipeline_mode = #tpu.pipeline_mode<synchronous>, transform_indices = @transform_7, window_bounds = array<i64: 256, 64>}, {pipeline_mode = #tpu.pipeline_mode<synchronous>, transform_indices = @transform_8, window_bounds = array<i64: 1, 64>}, {pipeline_mode = #tpu.pipeline_mode<synchronous>, transform_indices = @transform_9, window_bounds = array<i64: 64, 96>}, {pipeline_mode = #tpu.pipeline_mode<synchronous>, transform_indices = @transform_10, window_bounds = array<i64: 1, 96>}, {transform_indices = @transform_11, window_bounds = array<i64: 8, 32>}]} {
    %c0 = arith.constant 0 : index
    %c0_0 = arith.constant 0 : index
    %0 = vector.load %arg1[%c0, %c0_0] : memref<8x256xf32, #tpu.memory_space<vmem>>, vector<8x256xf32>
    %1 = arith.truncf %0 : vector<8x256xf32> to vector<8x256xbf16>
    %c0_1 = arith.constant 0 : index
    %c0_2 = arith.constant 0 : index
    %2 = vector.load %arg4[%c0_1, %c0_2] : memref<256x1024xbf16, #tpu.memory_space<vmem>>, vector<256x256xbf16>
    %cst = arith.constant dense<0.000000e+00> : vector<8x256xf32>
    %3 = tpu.matmul %1, %2, %cst {dimension_numbers = #tpu.dot_dimension_numbers<[1], [0], [0], [1], [0, 0, 1, 1], [], []>} : vector<8x256xbf16>, vector<256x256xbf16>, vector<8x256xf32> -> vector<8x256xf32>
    %c0_3 = arith.constant 0 : index
    %c256 = arith.constant 256 : index
    %4 = vector.load %arg4[%c0_3, %c256] : memref<256x1024xbf16, #tpu.memory_space<vmem>>, vector<256x256xbf16>
    %cst_4 = arith.constant dense<0.000000e+00> : vector<8x256xf32>
    %5 = tpu.matmul %1, %4, %cst_4 {dimension_numbers = #tpu.dot_dimension_numbers<[1], [0], [0], [1], [0, 0, 1, 1], [], []>} : vector<8x256xbf16>, vector<256x256xbf16>, vector<8x256xf32> -> vector<8x256xf32>
    %6 = arith.maximumf %3, %5 : vector<8x256xf32>
    %c0_5 = arith.constant 0 : index
    %c512 = arith.constant 512 : index
    %7 = vector.load %arg4[%c0_5, %c512] : memref<256x1024xbf16, #tpu.memory_space<vmem>>, vector<256x256xbf16>
    %cst_6 = arith.constant dense<0.000000e+00> : vector<8x256xf32>
    %8 = tpu.matmul %1, %7, %cst_6 {dimension_numbers = #tpu.dot_dimension_numbers<[1], [0], [0], [1], [0, 0, 1, 1], [], []>} : vector<8x256xbf16>, vector<256x256xbf16>, vector<8x256xf32> -> vector<8x256xf32>
    %9 = arith.maximumf %6, %8 : vector<8x256xf32>
    %c0_7 = arith.constant 0 : index
    %c768 = arith.constant 768 : index
    %10 = vector.load %arg4[%c0_7, %c768] : memref<256x1024xbf16, #tpu.memory_space<vmem>>, vector<256x256xbf16>
    %cst_8 = arith.constant dense<0.000000e+00> : vector<8x256xf32>
    %11 = tpu.matmul %1, %10, %cst_8 {dimension_numbers = #tpu.dot_dimension_numbers<[1], [0], [0], [1], [0, 0, 1, 1], [], []>} : vector<8x256xbf16>, vector<256x256xbf16>, vector<8x256xf32> -> vector<8x256xf32>
    %12 = arith.maximumf %9, %11 : vector<8x256xf32>
    %c0_9 = arith.constant 0 : index
    %c0_10 = arith.constant 0 : index
    %13 = vector.load %arg5[%c0_9, %c0_10] : memref<1x256xf32, #tpu.memory_space<vmem>>, vector<1x256xf32>
    %14 = vector.broadcast %13 : vector<1x256xf32> to vector<8x256xf32>
    %15 = arith.addf %12, %14 : vector<8x256xf32>
    %cst_11 = arith.constant 0.000000e+00 : f32
    %16 = vector.broadcast %cst_11 : f32 to vector<8x256xf32>
    %17 = arith.cmpf ogt, %15, %16 : vector<8x256xf32>
    %cst_12 = arith.constant 0.000000e+00 : f32
    %18 = vector.broadcast %cst_12 : f32 to vector<8x256xf32>
    %19 = arith.minimumf %15, %18 : vector<8x256xf32>
    %20 = math.exp %19 : vector<8x256xf32>
    %cst_13 = arith.constant 1.000000e+00 : f32
    %21 = vector.broadcast %cst_13 : f32 to vector<8x256xf32>
    %22 = arith.subf %20, %21 : vector<8x256xf32>
    %23 = arith.select %17, %15, %22 : vector<8x256xi1>, vector<8x256xf32>
    %c0_14 = arith.constant 0 : index
    %c0_15 = arith.constant 0 : index
    %24 = vector.load %arg2[%c0_14, %c0_15] : memref<8x32xf32, #tpu.memory_space<vmem>>, vector<8x32xf32>
    %c0_16 = arith.constant 0 : index
    %c0_17 = arith.constant 0 : index
    %25 = vector.load %arg3[%c0_16, %c0_17] : memref<8x32xf32, #tpu.memory_space<vmem>>, vector<8x32xf32>
    %c0_18 = arith.constant 0 : index
    %c0_19 = arith.constant 0 : index
    %26 = vector.load %arg6[%c0_18, %c0_19] : memref<32x64xf32, #tpu.memory_space<vmem>>, vector<32x64xf32>
    %cst_20 = arith.constant dense<0.000000e+00> : vector<8x64xf32>
    %27 = tpu.matmul %24, %26, %cst_20 {dimension_numbers = #tpu.dot_dimension_numbers<[1], [0], [0], [1], [0, 0, 1, 1], [], []>} : vector<8x32xf32>, vector<32x64xf32>, vector<8x64xf32> -> vector<8x64xf32>
    %c0_21 = arith.constant 0 : index
    %c0_22 = arith.constant 0 : index
    %28 = vector.load %arg7[%c0_21, %c0_22] : memref<32x64xf32, #tpu.memory_space<vmem>>, vector<32x64xf32>
    %cst_23 = arith.constant dense<0.000000e+00> : vector<8x64xf32>
    %29 = tpu.matmul %25, %28, %cst_23 {dimension_numbers = #tpu.dot_dimension_numbers<[1], [0], [0], [1], [0, 0, 1, 1], [], []>} : vector<8x32xf32>, vector<32x64xf32>, vector<8x64xf32> -> vector<8x64xf32>
    %30 = arith.addf %27, %29 : vector<8x64xf32>
    %31 = arith.truncf %23 : vector<8x256xf32> to vector<8x256xbf16>
    %c0_24 = arith.constant 0 : index
    %c0_25 = arith.constant 0 : index
    %32 = vector.load %arg8[%c0_24, %c0_25] : memref<256x64xbf16, #tpu.memory_space<vmem>>, vector<256x64xbf16>
    %cst_26 = arith.constant dense<0.000000e+00> : vector<8x64xf32>
    %33 = tpu.matmul %31, %32, %cst_26 {dimension_numbers = #tpu.dot_dimension_numbers<[1], [0], [0], [1], [0, 0, 1, 1], [], []>} : vector<8x256xbf16>, vector<256x64xbf16>, vector<8x64xf32> -> vector<8x64xf32>
    %34 = arith.addf %30, %33 : vector<8x64xf32>
    %c0_27 = arith.constant 0 : index
    %c0_28 = arith.constant 0 : index
    %35 = vector.load %arg9[%c0_27, %c0_28] : memref<1x64xf32, #tpu.memory_space<vmem>>, vector<1x64xf32>
    %36 = vector.broadcast %35 : vector<1x64xf32> to vector<8x64xf32>
    %37 = arith.addf %34, %36 : vector<8x64xf32>
    %cst_29 = arith.constant 0.000000e+00 : f32
    %38 = vector.broadcast %cst_29 : f32 to vector<8x64xf32>
    %39 = arith.maximumf %37, %38 : vector<8x64xf32>
    %c0_30 = arith.constant 0 : index
    %c0_31 = arith.constant 0 : index
    %40 = vector.load %arg10[%c0_30, %c0_31] : memref<64x96xf32, #tpu.memory_space<vmem>>, vector<64x96xf32>
    %cst_32 = arith.constant dense<0.000000e+00> : vector<8x96xf32>
    %41 = tpu.matmul %39, %40, %cst_32 {dimension_numbers = #tpu.dot_dimension_numbers<[1], [0], [0], [1], [0, 0, 1, 1], [], []>} : vector<8x64xf32>, vector<64x96xf32>, vector<8x96xf32> -> vector<8x96xf32>
    %c0_33 = arith.constant 0 : index
    %c0_34 = arith.constant 0 : index
    %42 = vector.load %arg11[%c0_33, %c0_34] : memref<1x96xf32, #tpu.memory_space<vmem>>, vector<1x96xf32>
    %43 = vector.broadcast %42 : vector<1x96xf32> to vector<8x96xf32>
    %44 = arith.addf %41, %43 : vector<8x96xf32>
    %45 = vector.extract_strided_slice %44 {offsets = [0, 0], sizes = [8, 32], strides = [1, 1]} : vector<8x96xf32> to vector<8x32xf32>
    %46 = vector.extract_strided_slice %44 {offsets = [0, 32], sizes = [8, 32], strides = [1, 1]} : vector<8x96xf32> to vector<8x32xf32>
    %47 = vector.extract_strided_slice %44 {offsets = [0, 64], sizes = [8, 32], strides = [1, 1]} : vector<8x96xf32> to vector<8x32xf32>
    %48 = arith.negf %47 : vector<8x32xf32>
    %49 = math.exp %48 : vector<8x32xf32>
    %cst_35 = arith.constant 1.000000e+00 : f32
    %50 = vector.broadcast %cst_35 : f32 to vector<8x32xf32>
    %51 = arith.addf %50, %49 : vector<8x32xf32>
    %52 = arith.divf %50, %51 : vector<8x32xf32>
    %53 = arith.mulf %52, %24 : vector<8x32xf32>
    %cst_36 = arith.constant 1.000000e+00 : f32
    %54 = vector.broadcast %cst_36 : f32 to vector<8x32xf32>
    %55 = arith.subf %54, %52 : vector<8x32xf32>
    %56 = arith.mulf %55, %25 : vector<8x32xf32>
    %57 = arith.addf %53, %56 : vector<8x32xf32>
    %58 = arith.negf %46 : vector<8x32xf32>
    %59 = math.exp %58 : vector<8x32xf32>
    %cst_37 = arith.constant 1.000000e+00 : f32
    %60 = vector.broadcast %cst_37 : f32 to vector<8x32xf32>
    %61 = arith.addf %60, %59 : vector<8x32xf32>
    %62 = arith.divf %60, %61 : vector<8x32xf32>
    %63 = arith.mulf %62, %57 : vector<8x32xf32>
    %cst_38 = arith.constant 1.000000e+00 : f32
    %64 = vector.broadcast %cst_38 : f32 to vector<8x32xf32>
    %65 = arith.subf %64, %62 : vector<8x32xf32>
    %66 = arith.mulf %65, %45 : vector<8x32xf32>
    %67 = arith.addf %63, %66 : vector<8x32xf32>
    %c0_39 = arith.constant 0 : index
    %c0_40 = arith.constant 0 : index
    %68 = vector.load %arg12[%c0_39, %c0_40] : memref<8x32xf32, #tpu.memory_space<vmem>>, vector<8x32xf32>
    tpu.vector_store %arg12[%c0_39, %c0_40], %67 {strides = array<i32>} : memref<8x32xf32, #tpu.memory_space<vmem>>, vector<8x32xf32>,
    return
  }
  func.func @transform_0(%arg0: i32) -> (i32, i32) {
    %c0_i32 = arith.constant 0 : i32
    %c0_i32_0 = arith.constant 0 : i32
    return %arg0, %c0_i32 : i32, i32
  }
  func.func @transform_1(%arg0: i32) -> (i32, i32) {
    %c0_i32 = arith.constant 0 : i32
    %c0_i32_0 = arith.constant 0 : i32
    return %arg0, %c0_i32 : i32, i32
  }
  func.func @transform_2(%arg0: i32) -> (i32, i32) {
    %c0_i32 = arith.constant 0 : i32
    %c0_i32_0 = arith.constant 0 : i32
    return %arg0, %c0_i32 : i32, i32
  }
  func.func @transform_3(%arg0: i32) -> (i32, i32) {
    %c0_i32 = arith.constant 0 : i32
    %c0_i32_0 = arith.constant 0 : i32
    %c0_i32_1 = arith.constant 0 : i32
    return %c0_i32, %c0_i32_0 : i32, i32
  }
  func.func @transform_4(%arg0: i32) -> (i32, i32) {
    %c0_i32 = arith.constant 0 : i32
    %c0_i32_0 = arith.constant 0 : i32
    %c0_i32_1 = arith.constant 0 : i32
    return %c0_i32, %c0_i32_0 : i32, i32
  }
  func.func @transform_5(%arg0: i32) -> (i32, i32) {
    %c0_i32 = arith.constant 0 : i32
    %c0_i32_0 = arith.constant 0 : i32
    %c0_i32_1 = arith.constant 0 : i32
    return %c0_i32, %c0_i32_0 : i32, i32
  }
  func.func @transform_6(%arg0: i32) -> (i32, i32) {
    %c0_i32 = arith.constant 0 : i32
    %c0_i32_0 = arith.constant 0 : i32
    %c0_i32_1 = arith.constant 0 : i32
    return %c0_i32, %c0_i32_0 : i32, i32
  }
  func.func @transform_7(%arg0: i32) -> (i32, i32) {
    %c0_i32 = arith.constant 0 : i32
    %c0_i32_0 = arith.constant 0 : i32
    %c0_i32_1 = arith.constant 0 : i32
    return %c0_i32, %c0_i32_0 : i32, i32
  }
  func.func @transform_8(%arg0: i32) -> (i32, i32) {
    %c0_i32 = arith.constant 0 : i32
    %c0_i32_0 = arith.constant 0 : i32
    %c0_i32_1 = arith.constant 0 : i32
    return %c0_i32, %c0_i32_0 : i32, i32
  }
  func.func @transform_9(%arg0: i32) -> (i32, i32) {
    %c0_i32 = arith.constant 0 : i32
    %c0_i32_0 = arith.constant 0 : i32
    %c0_i32_1 = arith.constant 0 : i32
    return %c0_i32, %c0_i32_0 : i32, i32
  }
  func.func @transform_10(%arg0: i32) -> (i32, i32) {
    %c0_i32 = arith.constant 0 : i32
    %c0_i32_0 = arith.constant 0 : i32
    %c0_i32_1 = arith.constant 0 : i32
    return %c0_i32, %c0_i32_0 : i32, i32
  }
  func.func @transform_11(%arg0: i32) -> (i32, i32) {
    %c0_i32 = arith.constant 0 : i32
    %c0_i32_0 = arith.constant 0 : i32
    return %arg0, %c0_i32 : i32, i32
  }
}

</mosaic_0001>

<bundles_post_ra>
// kernel: conv_edge_encoder_forward.1
= control target key start
LH: loop header
LB: loop body
LE: loop exit
PB: predicated region body
PF: predicated region fallthrough
CT: control target
= control target key end

     0   :  { %s2381_s0 = inlined_call_operand.vmem [shape: f32[8,256], index: 0, kind: input, shape index: {}]   ;;  %s2382_s1 = inlined_call_operand.vmem [shape: f32[8,32], index: 1, kind: input, shape index: {}]   ;;  %s2383_s2 = inlined_call_operand.vmem [shape: f32[8,32], index: 2, kind: input, shape index: {}]   ;;  %s2384_s3 = inlined_call_operand.vmem [shape: bf16[256,1024], index: 3, kind: input, shape index: {}]   ;;  %s2385_s4 = inlined_call_operand.vmem [shape: f32[1,256], index: 4, kind: input, shape index: {}]   ;;  %s2386_s5 = inlined_call_operand.vmem [shape: f32[32,64], index: 5, kind: input, shape index: {}]   ;;  %s2387_s6 = inlined_call_operand.vmem [shape: f32[32,64], index: 6, kind: input, shape index: {}]   ;;  %s2388_s7 = inlined_call_operand.vmem [shape: bf16[256,64], index: 7, kind: input, shape index: {}]   ;;  %s2389_s8 = inlined_call_operand.vmem [shape: f32[1,64], index: 8, kind: input, shape index: {}]   ;;  %s2390_s9 = inlined_call_operand.vmem [shape: f32[64,96], index: 9, kind: input, shape index: {}]   ;;  %s2391_s10 = inlined_call_operand.vmem [shape: f32[1,96], index: 10, kind: input, shape index: {}]   ;;  %s2392_s11 = inlined_call_operand.hbm [shape: f32[8,32], index: 11, kind: output, shape index: {}]  }
   0x1   :  { %v58_v0 = vld [vmem:[%s2384_s3 + $0x1c0] sm:$0xff]  ;;  %v291_v2 = vld [vmem:[%s2384_s3 + $0x1c8] sm:$0xff] }
   0x2   :  { %v59_v1 = vld [vmem:[%s2384_s3 + $0x1e0] sm:$0xff]  ;;  %v292_v4 = vld [vmem:[%s2384_s3 + $0x1e8] sm:$0xff] }
   0x3   :  { %v1495_v3 = vcombine.high %v58_v0, %v59_v1  ;;  %v1494_v5 = vcombine.low %v58_v0, %v59_v1  ;;  %v56_v6 = vld [vmem:[%s2384_s3 + $0x180] sm:$0xff]  ;;  %v1527_v8 = vcombine.high %v291_v2, %v292_v4  ;;  %v1526_v9 = vcombine.low %v291_v2, %v292_v4  ;;  %v289_v11 = vld [vmem:[%s2384_s3 + $0x188] sm:$0xff] }
   0x4   :  { %v57_v7 = vld [vmem:[%s2384_s3 + $0x1a0] sm:$0xff]  ;;  %v290_v12 = vld [vmem:[%s2384_s3 + $0x1a8] sm:$0xff] }
   0x5   :  { %v1493_v10 = vcombine.high %v56_v6, %v57_v7  ;;  %v54_v13 = vld [vmem:[%s2384_s3 + $0x140] sm:$0xff]  ;;  %236 = vmatprep.subr.bf16.mxu0 %v1495_v3  ;;  %v1525_v14 = vcombine.high %v289_v11, %v290_v12  ;;  %v287_v16 = vld [vmem:[%s2384_s3 + $0x148] sm:$0xff]  ;;  %469 = vmatprep.subr.bf16.mxu1 %v1527_v8  ;;  %v1492_v18 = vcombine.low %v56_v6, %v57_v7 }
   0x6   :  { %v55_v15 = vld [vmem:[%s2384_s3 + $0x160] sm:$0xff]  ;;  %v288_v17 = vld [vmem:[%s2384_s3 + $0x168] sm:$0xff]  ;;  %237 = vmatpush1.bf16.msra.mxu0 %v1494_v5  ;;  %470 = vmatpush1.bf16.msra.mxu1 %v1526_v9  ;;  %v1524_v19 = vcombine.low %v289_v11, %v290_v12 }
   0x7   :  { %238 = vmatprep.subr.bf16.mxu0 %v1493_v10  ;;  %v1491_v20 = vcombine.high %v54_v13, %v55_v15  ;;  %471 = vmatprep.subr.bf16.mxu1 %v1525_v14  ;;  %v1523_v21 = vcombine.high %v287_v16, %v288_v17  ;;  %v52_v22 = vld [vmem:[%s2384_s3 + $0x100] sm:$0xff]  ;;  %v285_v24 = vld [vmem:[%s2384_s3 + $0x108] sm:$0xff]  ;;  %v1490_v26 = vcombine.low %v54_v13, %v55_v15 }
   0x8   :  { %v53_v23 = vld [vmem:[%s2384_s3 + $0x120] sm:$0xff]  ;;  %v286_v25 = vld [vmem:[%s2384_s3 + $0x128] sm:$0xff]  ;;  %v1522_v27 = vcombine.low %v287_v16, %v288_v17 }
   0x9   :  { %v1489_v28 = vcombine.high %v52_v22, %v53_v23  ;;  %v1521_v29 = vcombine.high %v285_v24, %v286_v25  ;;  %v50_v30 = vld [vmem:[%s2384_s3 + $0xc0] sm:$0xff]  ;;  %v283_v32 = vld [vmem:[%s2384_s3 + $0xc8] sm:$0xff]  ;;  %v1488_v34 = vcombine.low %v52_v22, %v53_v23  ;;  %v1520_v35 = vcombine.low %v285_v24, %v286_v25 }
   0xa   :  { %239 = vmatpush1.bf16.msra.mxu0 %v1492_v18  ;;  %472 = vmatpush1.bf16.msra.mxu1 %v1524_v19  ;;  %v51_v31 = vld [vmem:[%s2384_s3 + $0xe0] sm:$0xff]  ;;  %v284_v33 = vld [vmem:[%s2384_s3 + $0xe8] sm:$0xff] }
   0xb   :  { %240 = vmatprep.subr.bf16.mxu0 %v1491_v20  ;;  %473 = vmatprep.subr.bf16.mxu1 %v1523_v21  ;;  %v1487_v36 = vcombine.high %v50_v30, %v51_v31  ;;  %v1519_v37 = vcombine.high %v283_v32, %v284_v33  ;;  %v48_v38 = vld [vmem:[%s2384_s3 + $0x80] sm:$0xff]  ;;  %v281_v40 = vld [vmem:[%s2384_s3 + $0x88] sm:$0xff]  ;;  %v1486_v42 = vcombine.low %v50_v30, %v51_v31 }
   0xc   :  { %v49_v39 = vld [vmem:[%s2384_s3 + $0xa0] sm:$0xff]  ;;  %v282_v41 = vld [vmem:[%s2384_s3 + $0xa8] sm:$0xff]  ;;  %v1518_v43 = vcombine.low %v283_v32, %v284_v33 }
   0xd   :  { %v1485_v44 = vcombine.high %v48_v38, %v49_v39  ;;  %v1517_v45 = vcombine.high %v281_v40, %v282_v41  ;;  %v46_v46 = vld [vmem:[%s2384_s3 + $0x40] sm:$0xff]  ;;  %v279_v48 = vld [vmem:[%s2384_s3 + $0x48] sm:$0xff]  ;;  %v1484_v50 = vcombine.low %v48_v38, %v49_v39  ;;  %v1516_v51 = vcombine.low %v281_v40, %v282_v41 }
   0xe   :  { %241 = vmatpush1.bf16.msra.mxu0 %v1490_v26  ;;  %474 = vmatpush1.bf16.msra.mxu1 %v1522_v27  ;;  %v47_v47 = vld [vmem:[%s2384_s3 + $0x60] sm:$0xff]  ;;  %v280_v49 = vld [vmem:[%s2384_s3 + $0x68] sm:$0xff] }
   0xf   :  { %242 = vmatprep.subr.bf16.mxu0 %v1489_v28  ;;  %475 = vmatprep.subr.bf16.mxu1 %v1521_v29  ;;  %v1483_v52 = vcombine.high %v46_v46, %v47_v47  ;;  %v41_v53 = vld [vmem:[%s2381_s0 + $0x8] sm:$0xff]  ;;  %v1515_v54 = vcombine.high %v279_v48, %v280_v49  ;;  %v44_v55 = vld [vmem:[%s2384_s3] sm:$0xff]  ;;  %v1482_v60 = vcombine.low %v46_v46, %v47_v47 }
  0x10   :  { %v45_v56 = vld [vmem:[%s2384_s3 + $0x20] sm:$0xff]  ;;  %v1925_v57 = vpack.c.bf16 %v41_v53, %v41_v53  ;;  %v277_v58 = vld [vmem:[%s2384_s3 + $0x8] sm:$0xff]  ;;  %v1514_v61 = vcombine.low %v279_v48, %v280_v49 }
  0x11   :  { %v278_v59 = vld [vmem:[%s2384_s3 + $0x28] sm:$0xff]  ;;  %v1481_v62 = vcombine.high %v44_v55, %v45_v56  ;;  %v74_v0 = vld [vmem:[%s2384_s3 + $0x3c0] sm:$0xff]  ;;  %v1480_v4 = vcombine.low %v44_v55, %v45_v56 }
  0x12   :  { %243 = vmatpush1.bf16.msra.mxu0 %v1488_v34  ;;  %476 = vmatpush1.bf16.msra.mxu1 %v1520_v35  ;;  %v1513_v63 = vcombine.high %v277_v58, %v278_v59  ;;  %v75_v1 = vld [vmem:[%s2384_s3 + $0x3e0] sm:$0xff]  ;;  %v307_v2 = vld [vmem:[%s2384_s3 + $0x3c8] sm:$0xff]  ;;  %v1512_v5 = vcombine.low %v277_v58, %v278_v59 }
  0x13   :  { %244 = vmatprep.subr.bf16.mxu0 %v1487_v36  ;;  %477 = vmatprep.subr.bf16.mxu1 %v1519_v37  ;;  %v308_v3 = vld [vmem:[%s2384_s3 + $0x3e8] sm:$0xff]  ;;  %v1511_v6 = vcombine.high %v74_v0, %v75_v1  ;;  %v72_v8 = vld [vmem:[%s2384_s3 + $0x380] sm:$0xff]  ;;  %v1510_v12 = vcombine.low %v74_v0, %v75_v1 }
  0x14   :  { %268 = vmatprep.mubr.bf16.mxu0 %v1925_v57  ;;  %501 = vmatprep.mubr.bf16.mxu1 %v1925_v57  ;;  %v1543_v7 = vcombine.high %v307_v2, %v308_v3  ;;  %v73_v9 = vld [vmem:[%s2384_s3 + $0x3a0] sm:$0xff]  ;;  %v305_v10 = vld [vmem:[%s2384_s3 + $0x388] sm:$0xff]  ;;  %v1542_v13 = vcombine.low %v307_v2, %v308_v3 }
  0x15   :  { %v306_v11 = vld [vmem:[%s2384_s3 + $0x3a8] sm:$0xff]  ;;  %v1509_v14 = vcombine.high %v72_v8, %v73_v9  ;;  %v70_v16 = vld [vmem:[%s2384_s3 + $0x340] sm:$0xff]  ;;  %v1508_v20 = vcombine.low %v72_v8, %v73_v9 }
  0x16   :  { %245 = vmatpush1.bf16.msra.mxu0 %v1486_v42  ;;  %478 = vmatpush1.bf16.msra.mxu1 %v1518_v43  ;;  %v1541_v15 = vcombine.high %v305_v10, %v306_v11  ;;  %v71_v17 = vld [vmem:[%s2384_s3 + $0x360] sm:$0xff]  ;;  %v303_v18 = vld [vmem:[%s2384_s3 + $0x348] sm:$0xff]  ;;  %v1540_v21 = vcombine.low %v305_v10, %v306_v11 }
  0x17   :  { %246 = vmatprep.subr.bf16.mxu0 %v1485_v44  ;;  %479 = vmatprep.subr.bf16.mxu1 %v1517_v45  ;;  %v304_v19 = vld [vmem:[%s2384_s3 + $0x368] sm:$0xff]  ;;  %v1507_v22 = vcombine.high %v70_v16, %v71_v17  ;;  %v68_v24 = vld [vmem:[%s2384_s3 + $0x300] sm:$0xff]  ;;  %v1506_v28 = vcombine.low %v70_v16, %v71_v17 }
  0x18   :  { %v1539_v23 = vcombine.high %v303_v18, %v304_v19  ;;  %v69_v25 = vld [vmem:[%s2384_s3 + $0x320] sm:$0xff]  ;;  %v301_v26 = vld [vmem:[%s2384_s3 + $0x308] sm:$0xff]  ;;  %v1538_v29 = vcombine.low %v303_v18, %v304_v19 }
  0x19   :  { %v302_v27 = vld [vmem:[%s2384_s3 + $0x328] sm:$0xff]  ;;  %v1505_v30 = vcombine.high %v68_v24, %v69_v25  ;;  %v66_v32 = vld [vmem:[%s2384_s3 + $0x2c0] sm:$0xff]  ;;  %v1504_v36 = vcombine.low %v68_v24, %v69_v25 }
  0x1a   :  { %247 = vmatpush1.bf16.msra.mxu0 %v1484_v50  ;;  %480 = vmatpush1.bf16.msra.mxu1 %v1516_v51  ;;  %v1537_v31 = vcombine.high %v301_v26, %v302_v27  ;;  %v67_v33 = vld [vmem:[%s2384_s3 + $0x2e0] sm:$0xff]  ;;  %v299_v34 = vld [vmem:[%s2384_s3 + $0x2c8] sm:$0xff]  ;;  %v1536_v39 = vcombine.low %v301_v26, %v302_v27 }
  0x1b   :  { %248 = vmatprep.subr.bf16.mxu0 %v1483_v52  ;;  %481 = vmatprep.subr.bf16.mxu1 %v1515_v54  ;;  %v300_v35 = vld [vmem:[%s2384_s3 + $0x2e8] sm:$0xff]  ;;  %v64_v37 = vld [vmem:[%s2384_s3 + $0x280] sm:$0xff]  ;;  %v1503_v40 = vcombine.high %v66_v32, %v67_v33  ;;  %v1502_v44 = vcombine.low %v66_v32, %v67_v33 }
  0x1c   :  { %v65_v38 = vld [vmem:[%s2384_s3 + $0x2a0] sm:$0xff]  ;;  %v297_v41 = vld [vmem:[%s2384_s3 + $0x288] sm:$0xff]  ;;  %v1535_v43 = vcombine.high %v299_v34, %v300_v35  ;;  %v1534_v47 = vcombine.low %v299_v34, %v300_v35 }
  0x1d   :  { %v298_v42 = vld [vmem:[%s2384_s3 + $0x2a8] sm:$0xff]  ;;  %v62_v45 = vld [vmem:[%s2384_s3 + $0x240] sm:$0xff]  ;;  %v1501_v48 = vcombine.high %v64_v37, %v65_v38  ;;  %v1500_v52 = vcombine.low %v64_v37, %v65_v38 }
  0x1e   :  { %249 = vmatpush1.bf16.msra.mxu0 %v1482_v60  ;;  %482 = vmatpush1.bf16.msra.mxu1 %v1514_v61  ;;  %v63_v46 = vld [vmem:[%s2384_s3 + $0x260] sm:$0xff]  ;;  %v295_v49 = vld [vmem:[%s2384_s3 + $0x248] sm:$0xff]  ;;  %v1533_v51 = vcombine.high %v297_v41, %v298_v42  ;;  %v1532_v53 = vcombine.low %v297_v41, %v298_v42 }
  0x1f   :  { %250 = vmatprep.subr.bf16.mxu0 %v1481_v62  ;;  %483 = vmatprep.subr.bf16.mxu1 %v1513_v63  ;;  %v296_v50 = vld [vmem:[%s2384_s3 + $0x268] sm:$0xff]  ;;  %v1499_v54 = vcombine.high %v62_v45, %v63_v46  ;;  %v60_v56 = vld [vmem:[%s2384_s3 + $0x200] sm:$0xff] }
  0x20   :  { %v1531_v55 = vcombine.high %v295_v49, %v296_v50  ;;  %v61_v58 = vld [vmem:[%s2384_s3 + $0x220] sm:$0xff] }
  0x22   :  { %251 = vmatpush1.bf16.msra.mxu0 %v1480_v4  ;;  %484 = vmatpush1.bf16.msra.mxu1 %v1512_v5 }
  0x23   :  { %252 = vmatprep.subr.bf16.mxu0 %v1511_v6  ;;  %485 = vmatprep.subr.bf16.mxu1 %v1543_v7 }
  0x26   :  { %253 = vmatpush2.bf16.msra.mxu0 %v1510_v12  ;;  %486 = vmatpush2.bf16.msra.mxu1 %v1542_v13 }
  0x27   :  { %254 = vmatprep.subr.bf16.mxu0 %v1509_v14  ;;  %487 = vmatprep.subr.bf16.mxu1 %v1541_v15 }
  0x2a   :  { %255 = vmatpush2.bf16.msra.mxu0 %v1508_v20  ;;  %488 = vmatpush2.bf16.msra.mxu1 %v1540_v21 }
  0x2b   :  { %256 = vmatprep.subr.bf16.mxu0 %v1507_v22  ;;  %489 = vmatprep.subr.bf16.mxu1 %v1539_v23 }
  0x2e   :  { %257 = vmatpush2.bf16.msra.mxu0 %v1506_v28  ;;  %490 = vmatpush2.bf16.msra.mxu1 %v1538_v29 }
  0x2f   :  { %258 = vmatprep.subr.bf16.mxu0 %v1505_v30  ;;  %491 = vmatprep.subr.bf16.mxu1 %v1537_v31 }
  0x32   :  { %259 = vmatpush2.bf16.msra.mxu0 %v1504_v36  ;;  %492 = vmatpush2.bf16.msra.mxu1 %v1536_v39 }
  0x33   :  { %260 = vmatprep.subr.bf16.mxu0 %v1503_v40  ;;  %493 = vmatprep.subr.bf16.mxu1 %v1535_v43 }
  0x36   :  { %261 = vmatpush2.bf16.msra.mxu0 %v1502_v44  ;;  %494 = vmatpush2.bf16.msra.mxu1 %v1534_v47 }
  0x37   :  { %262 = vmatprep.subr.bf16.mxu0 %v1501_v48  ;;  %495 = vmatprep.subr.bf16.mxu1 %v1533_v51 }
  0x38   :  { %16 = vsyncpa [#allocation3], 0  ;;  %v293_v59 = vld [vmem:[%s2384_s3 + $0x208] sm:$0xff]  ;;  %v1498_v61 = vcombine.low %v62_v45, %v63_v46  ;;  %v1530_v62 = vcombine.low %v295_v49, %v296_v50  ;;  %v1497_v63 = vcombine.high %v60_v56, %v61_v58  ;;  %v526_v1 = vld [vmem:[%s2384_s3 + $0x1d0] sm:$0xff]  ;;  %v1496_v5 = vcombine.low %v60_v56, %v61_v58  ;;  %s1768_s23 = smov 64   ;;  %s1770_s26 = smov 32  }
  0x39   :  { %v294_v60 = vld [vmem:[%s2384_s3 + $0x228] sm:$0xff]  ;;  %v527_v2 = vld [vmem:[%s2384_s3 + $0x1f0] sm:$0xff]  ;;  %v761_v3 = vld [vmem:[%s2384_s3 + $0x1d8] sm:$0xff]  ;;  %vm1767_vm0 = vmmov 0   ;;  %vm1018_vm1 = vcmask 261120   ;;  %vm1360_vm4 = vcmask 523264  }
  0x3a   :  { %263 = vmatpush2.bf16.msra.mxu0 %v1500_v52  ;;  %496 = vmatpush2.bf16.msra.mxu1 %v1532_v53  ;;  %v1529_v0 = vcombine.high %v293_v59, %v294_v60  ;;  %v762_v4 = vld [vmem:[%s2384_s3 + $0x1f8] sm:$0xff]  ;;  %v40_v6 = vld [vmem:[%s2381_s0] sm:$0xff]  ;;  %v1528_v7 = vcombine.low %v293_v59, %v294_v60  ;;  %v1559_v8 = vcombine.high %v526_v1, %v527_v2  ;;  %v524_v10 = vld [vmem:[%s2384_s3 + $0x190] sm:$0xff] }
  0x3b   :  { %264 = vmatprep.subr.bf16.mxu0 %v1499_v54  ;;  %497 = vmatprep.subr.bf16.mxu1 %v1531_v55  ;;  %v1591_v9 = vcombine.high %v761_v3, %v762_v4  ;;  %v525_v11 = vld [vmem:[%s2384_s3 + $0x1b0] sm:$0xff]  ;;  %v2052_v12 = vpack.c.bf16 %v40_v6, %v40_v6  ;;  %v759_v13 = vld [vmem:[%s2384_s3 + $0x198] sm:$0xff]  ;;  %v1558_v15 = vcombine.low %v526_v1, %v527_v2 }
  0x3c   :  { %v760_v14 = vld [vmem:[%s2384_s3 + $0x1b8] sm:$0xff]  ;;  %v1590_v16 = vcombine.low %v761_v3, %v762_v4  ;;  %v1557_v17 = vcombine.high %v524_v10, %v525_v11  ;;  %v522_v19 = vld [vmem:[%s2384_s3 + $0x150] sm:$0xff]  ;;  %v1556_v23 = vcombine.low %v524_v10, %v525_v11 }
  0x3d   :  { %v1589_v18 = vcombine.high %v759_v13, %v760_v14  ;;  %v523_v20 = vld [vmem:[%s2384_s3 + $0x170] sm:$0xff]  ;;  %v757_v21 = vld [vmem:[%s2384_s3 + $0x158] sm:$0xff]  ;;  %v1588_v24 = vcombine.low %v759_v13, %v760_v14 }
  0x3e   :  { %265 = vmatpush2.bf16.msra.mxu0 %v1498_v61  ;;  %498 = vmatpush2.bf16.msra.mxu1 %v1530_v62  ;;  %v758_v22 = vld [vmem:[%s2384_s3 + $0x178] sm:$0xff]  ;;  %v1555_v25 = vcombine.high %v522_v19, %v523_v20  ;;  %v520_v27 = vld [vmem:[%s2384_s3 + $0x110] sm:$0xff]  ;;  %v1554_v31 = vcombine.low %v522_v19, %v523_v20 }
  0x3f   :  { %266 = vmatprep.subr.bf16.mxu0 %v1497_v63  ;;  %499 = vmatprep.subr.bf16.mxu1 %v1529_v0  ;;  %v1587_v26 = vcombine.high %v757_v21, %v758_v22  ;;  %v521_v28 = vld [vmem:[%s2384_s3 + $0x130] sm:$0xff]  ;;  %v755_v29 = vld [vmem:[%s2384_s3 + $0x118] sm:$0xff]  ;;  %v1586_v32 = vcombine.low %v757_v21, %v758_v22 }
  0x40   :  { %v756_v30 = vld [vmem:[%s2384_s3 + $0x138] sm:$0xff]  ;;  %v1553_v33 = vcombine.high %v520_v27, %v521_v28  ;;  %v518_v35 = vld [vmem:[%s2384_s3 + $0xd0] sm:$0xff]  ;;  %v1552_v38 = vcombine.low %v520_v27, %v521_v28 }
  0x41   :  { %v1585_v34 = vcombine.high %v755_v29, %v756_v30  ;;  %v519_v36 = vld [vmem:[%s2384_s3 + $0xf0] sm:$0xff]  ;;  %v754_v37 = vld [vmem:[%s2384_s3 + $0xf8] sm:$0xff]  ;;  %v1584_v39 = vcombine.low %v755_v29, %v756_v30 }
  0x42   :  { %267 = vmatpush2.bf16.msra.mxu0 %v1496_v5  ;;  %500 = vmatpush2.bf16.msra.mxu1 %v1528_v7  ;;  %v1551_v40 = vcombine.high %v518_v35, %v519_v36  ;;  %v516_v42 = vld [vmem:[%s2384_s3 + $0x90] sm:$0xff]  ;;  %v751_v44 = vld [vmem:[%s2384_s3 + $0x98] sm:$0xff]  ;;  %v1550_v46 = vcombine.low %v518_v35, %v519_v36 }
  0x43   :  { %704 = vmatprep.subr.bf16.mxu0 %v1559_v8  ;;  %939 = vmatprep.subr.bf16.mxu1 %v1591_v9  ;;  %v517_v43 = vld [vmem:[%s2384_s3 + $0xb0] sm:$0xff]  ;;  %v752_v45 = vld [vmem:[%s2384_s3 + $0xb8] sm:$0xff] }
  0x44   :  { %v1549_v48 = vcombine.high %v516_v42, %v517_v43  ;;  %v1581_v49 = vcombine.high %v751_v44, %v752_v45  ;;  %v514_v50 = vld [vmem:[%s2384_s3 + $0x50] sm:$0xff]  ;;  %v749_v52 = vld [vmem:[%s2384_s3 + $0x58] sm:$0xff]  ;;  %v1548_v54 = vcombine.low %v516_v42, %v517_v43  ;;  %v1580_v55 = vcombine.low %v751_v44, %v752_v45 }
  0x45   :  { %269 = vmatmul.mubr.bf16.vlgmr.msra.gmra.mxu0 %v2052_v12  ;;  %502 = vmatmul.mubr.bf16.vlgmr.msra.gmra.mxu1 %v2052_v12  ;;  %v515_v51 = vld [vmem:[%s2384_s3 + $0x70] sm:$0xff]  ;;  %v750_v53 = vld [vmem:[%s2384_s3 + $0x78] sm:$0xff] }
  0x46   :  { %705 = vmatpush1.bf16.msra.mxu0 %v1558_v15  ;;  %940 = vmatpush1.bf16.msra.mxu1 %v1590_v16  ;;  %v1547_v56 = vcombine.high %v514_v50, %v515_v51  ;;  %v1579_v58 = vcombine.high %v749_v52, %v750_v53  ;;  %v512_v59 = vld [vmem:[%s2384_s3 + $0x10] sm:$0xff]  ;;  %v747_v61 = vld [vmem:[%s2384_s3 + $0x18] sm:$0xff]  ;;  %v1546_v63 = vcombine.low %v514_v50, %v515_v51 }
  0x47   :  { %706 = vmatprep.subr.bf16.mxu0 %v1557_v17  ;;  %941 = vmatprep.subr.bf16.mxu1 %v1589_v18  ;;  %v513_v60 = vld [vmem:[%s2384_s3 + $0x30] sm:$0xff]  ;;  %v748_v62 = vld [vmem:[%s2384_s3 + $0x38] sm:$0xff]  ;;  %v1578_v0 = vcombine.low %v749_v52, %v750_v53 }
  0x48   :  { %736 = vmatprep.mubr.bf16.mxu0 %v1925_v57  ;;  %971 = vmatprep.mubr.bf16.mxu1 %v1925_v57  ;;  %v753_v57 = vld [vmem:[%s2384_s3 + $0xd8] sm:$0xff]  ;;  %v1545_v1 = vcombine.high %v512_v59, %v513_v60  ;;  %v1577_v2 = vcombine.high %v747_v61, %v748_v62  ;;  %v542_v3 = vld [vmem:[%s2384_s3 + $0x3d0] sm:$0xff]  ;;  %v1544_v7 = vcombine.low %v512_v59, %v513_v60 }
  0x49   :  { %v1583_v41 = vcombine.high %v753_v57, %v754_v37  ;;  %v1582_v47 = vcombine.low %v753_v57, %v754_v37  ;;  %v543_v4 = vld [vmem:[%s2384_s3 + $0x3f0] sm:$0xff]  ;;  %v777_v5 = vld [vmem:[%s2384_s3 + $0x3d8] sm:$0xff]  ;;  %v1576_v8 = vcombine.low %v747_v61, %v748_v62 }
  0x4a   :  { %707 = vmatpush1.bf16.msra.mxu0 %v1556_v23  ;;  %942 = vmatpush1.bf16.msra.mxu1 %v1588_v24  ;;  %v778_v6 = vld [vmem:[%s2384_s3 + $0x3f8] sm:$0xff]  ;;  %v1575_v9 = vcombine.high %v542_v3, %v543_v4  ;;  %v540_v11 = vld [vmem:[%s2384_s3 + $0x390] sm:$0xff]  ;;  %v1574_v16 = vcombine.low %v542_v3, %v543_v4 }
  0x4b   :  { %708 = vmatprep.subr.bf16.mxu0 %v1555_v25  ;;  %943 = vmatprep.subr.bf16.mxu1 %v1587_v26  ;;  %v1607_v10 = vcombine.high %v777_v5, %v778_v6  ;;  %v541_v13 = vld [vmem:[%s2384_s3 + $0x3b0] sm:$0xff]  ;;  %v775_v14 = vld [vmem:[%s2384_s3 + $0x398] sm:$0xff]  ;;  %v1606_v17 = vcombine.low %v777_v5, %v778_v6 }
  0x4c   :  { %v776_v15 = vld [vmem:[%s2384_s3 + $0x3b8] sm:$0xff]  ;;  %v1573_v18 = vcombine.high %v540_v11, %v541_v13  ;;  %v538_v20 = vld [vmem:[%s2384_s3 + $0x350] sm:$0xff]  ;;  %v1572_v24 = vcombine.low %v540_v11, %v541_v13  ;;  %v1726_v11 = vld [vmem:[%s2388_s7 + $0x60] sm:$0xff]   ;;  %v1766_v13 = vmov 0.0  }
  0x4d   :  { %v1605_v19 = vcombine.high %v775_v14, %v776_v15  ;;  %v539_v21 = vld [vmem:[%s2384_s3 + $0x370] sm:$0xff]  ;;  %v773_v22 = vld [vmem:[%s2384_s3 + $0x358] sm:$0xff]  ;;  %v1604_v25 = vcombine.low %v775_v14, %v776_v15  ;;  %v1727_v15 = vld [vmem:[%s2388_s7 + $0x20] sm:$0xff]  }
  0x4e   :  { %709 = vmatpush1.bf16.msra.mxu0 %v1554_v31  ;;  %944 = vmatpush1.bf16.msra.mxu1 %v1586_v32  ;;  %v774_v23 = vld [vmem:[%s2384_s3 + $0x378] sm:$0xff]  ;;  %v1571_v26 = vcombine.high %v538_v20, %v539_v21  ;;  %v536_v28 = vld [vmem:[%s2384_s3 + $0x310] sm:$0xff]  ;;  %v1570_v32 = vcombine.low %v538_v20, %v539_v21  ;;  %v1014_v20 = vld [vmem:[%s2387_s6] sm:$0xff] }
  0x4f   :  { %710 = vmatprep.subr.bf16.mxu0 %v1553_v33  ;;  %945 = vmatprep.subr.bf16.mxu1 %v1585_v34  ;;  %v1603_v27 = vcombine.high %v773_v22, %v774_v23  ;;  %v537_v29 = vld [vmem:[%s2384_s3 + $0x330] sm:$0xff]  ;;  %v771_v30 = vld [vmem:[%s2384_s3 + $0x318] sm:$0xff]  ;;  %v1602_v33 = vcombine.low %v773_v22, %v774_v23  ;;  %v2289_v22 = vld [vmem:[%s2383_s2] sm:$0xff] }
  0x50   :  { %v772_v31 = vld [vmem:[%s2384_s3 + $0x338] sm:$0xff]  ;;  %v1569_v34 = vcombine.high %v536_v28, %v537_v29  ;;  %v534_v36 = vld [vmem:[%s2384_s3 + $0x2d0] sm:$0xff] }
  0x51   :  { %v1601_v35 = vcombine.high %v771_v30, %v772_v31  ;;  %v535_v57 = vld [vmem:[%s2384_s3 + $0x2f0] sm:$0xff]  ;;  %v769_v37 = vld [vmem:[%s2384_s3 + $0x2d8] sm:$0xff] }
  0x52   :  { %711 = vmatpush1.bf16.msra.mxu0 %v1552_v38  ;;  %946 = vmatpush1.bf16.msra.mxu1 %v1584_v39  ;;  %v770_v38 = vld [vmem:[%s2384_s3 + $0x2f8] sm:$0xff]  ;;  %v1568_v39 = vcombine.low %v536_v28, %v537_v29  ;;  %v532_v43 = vld [vmem:[%s2384_s3 + $0x290] sm:$0xff]  ;;  %v1733_v28 = vld [vmem:[%s2388_s7 + $0x8] sm:$0xff]  }
  0x53   :  { %712 = vmatprep.subr.bf16.mxu0 %v1551_v40  ;;  %947 = vmatprep.subr.bf16.mxu1 %v1583_v41  ;;  %v1600_v40 = vcombine.low %v771_v30, %v772_v31  ;;  %v1567_v41 = vcombine.high %v534_v36, %v535_v57  ;;  %v1599_v42 = vcombine.high %v769_v37, %v770_v38  ;;  %v533_v44 = vld [vmem:[%s2384_s3 + $0x2b0] sm:$0xff]  ;;  %v767_v45 = vld [vmem:[%s2384_s3 + $0x298] sm:$0xff]  ;;  %v1010_v29 = vld [vmem:[%s2386_s5] sm:$0xff] }
  0x54   :  { %v530_v51 = vld [vmem:[%s2384_s3 + $0x250] sm:$0xff]  ;;  %v765_v53 = vld [vmem:[%s2384_s3 + $0x258] sm:$0xff]  ;;  %v2322_v30 = vld [vmem:[%s2382_s1] sm:$0xff] }
  0x55   :  { %v531_v52 = vld [vmem:[%s2384_s3 + $0x270] sm:$0xff]  ;;  %v763_v62 = vld [vmem:[%s2384_s3 + $0x218] sm:$0xff]  ;;  %v1734_v31 = vld [vmem:[%s2388_s7 + $0x40] sm:$0xff]   ;;  %1440 = vrot.lane.b32.xlu0 %v2322_v30, %s1768_s23 }
  0x56   :  { %713 = vmatpush1.bf16.msra.mxu0 %v1550_v46  ;;  %948 = vmatpush1.bf16.msra.mxu1 %v1582_v47  ;;  %v768_v46 = vld [vmem:[%s2384_s3 + $0x2b8] sm:$0xff]  ;;  %v1566_v47 = vcombine.low %v534_v36, %v535_v57  ;;  %v528_v60 = vld [vmem:[%s2384_s3 + $0x210] sm:$0xff] }
  0x57   :  { %714 = vmatprep.subr.bf16.mxu0 %v1549_v48  ;;  %949 = vmatprep.subr.bf16.mxu1 %v1581_v49  ;;  %v1598_v48 = vcombine.low %v769_v37, %v770_v38  ;;  %v1565_v49 = vcombine.high %v532_v43, %v533_v44  ;;  %v1597_v50 = vcombine.high %v767_v45, %v768_v46  ;;  %v529_v61 = vld [vmem:[%s2384_s3 + $0x230] sm:$0xff]  ;;  %v1720_v6 = vld [vmem:[%s2388_s7 + $0x78] sm:$0xff]  }
  0x58   :  { %v1560_v4 = vcombine.low %v528_v60, %v529_v61  ;;  %v1017_v14 = vld [vmem:[%s2387_s6 + $0x18] sm:$0xff]  ;;  %v1730_v21 = vld [vmem:[%s2388_s7 + $0x50] sm:$0xff]  }
  0x59   :  { %v1013_v23 = vld [vmem:[%s2386_s5 + $0x18] sm:$0xff]  ;;  %1445 = vrot.lane.b32.xlu0 %v2289_v22, %s1768_s23 }
  0x5a   :  { %715 = vmatpush1.bf16.msra.mxu0 %v1548_v54  ;;  %950 = vmatpush1.bf16.msra.mxu1 %v1580_v55  ;;  %v766_v54 = vld [vmem:[%s2384_s3 + $0x278] sm:$0xff]  ;;  %v1564_v55 = vcombine.low %v532_v43, %v533_v44  ;;  %v984_v43 = vlaneseq }
  0x5b   :  { %716 = vmatprep.subr.bf16.mxu0 %v1547_v56  ;;  %951 = vmatprep.subr.bf16.mxu1 %v1579_v58  ;;  %v1596_v56 = vcombine.low %v767_v45, %v768_v46  ;;  %v1563_v58 = vcombine.high %v530_v51, %v531_v52  ;;  %v1595_v59 = vcombine.high %v765_v53, %v766_v54  ;;  %v982_v46 = vld [vmem:[%s2385_s4] sm:$0x3] }
  0x5c   :  { %v985_v44 = vshrl.u32 %v984_v43, 7 }
  0x5e   :  { %717 = vmatpush1.bf16.msra.mxu0 %v1546_v63  ;;  %952 = vmatpush1.bf16.msra.mxu1 %v1578_v0  ;;  %v764_v63 = vld [vmem:[%s2384_s3 + $0x238] sm:$0xff]  ;;  %v1562_v0 = vcombine.low %v530_v51, %v531_v52  ;;  %v986_v45 = vsub.s32 0, %v985_v44 }
  0x5f   :  { %718 = vmatprep.subr.bf16.mxu0 %v1545_v1  ;;  %953 = vmatprep.subr.bf16.mxu1 %v1577_v2  ;;  %v1594_v1 = vcombine.low %v765_v53, %v766_v54  ;;  %v1561_v2 = vcombine.high %v528_v60, %v529_v61  ;;  %v1593_v3 = vcombine.high %v763_v62, %v764_v63 }
  0x60   :  { %v1592_v5 = vcombine.low %v763_v62, %v764_v63  ;;  %v987_v52 = vrot.slane %v982_v46, %v986_v45 }
  0x62   :  { %719 = vmatpush1.bf16.msra.mxu0 %v1544_v7  ;;  %954 = vmatpush1.bf16.msra.mxu1 %v1576_v8  ;;  %v1721_v7 = vld [vmem:[%s2388_s7 + $0x38] sm:$0xff]   ;;  %v1722_v8 = vld [vmem:[%s2388_s7 + $0x70] sm:$0xff]  }
  0x63   :  { %720 = vmatprep.subr.bf16.mxu0 %v1575_v9  ;;  %955 = vmatprep.subr.bf16.mxu1 %v1607_v10  ;;  %v1723_v9 = vld [vmem:[%s2388_s7 + $0x30] sm:$0xff]   ;;  %v1725_v10 = vld [vmem:[%s2388_s7 + $0x28] sm:$0xff]  }
  0x66   :  { %721 = vmatpush2.bf16.msra.mxu0 %v1574_v16  ;;  %956 = vmatpush2.bf16.msra.mxu1 %v1606_v17  ;;  %v1016_v16 = vld [vmem:[%s2387_s6 + $0x10] sm:$0xff]  ;;  %v1728_v17 = vld [vmem:[%s2388_s7 + $0x58] sm:$0xff]  }
  0x67   :  { %722 = vmatprep.subr.bf16.mxu0 %v1573_v18  ;;  %957 = vmatprep.subr.bf16.mxu1 %v1605_v19  ;;  %v1015_v18 = vld [vmem:[%s2387_s6 + $0x8] sm:$0xff]  ;;  %v1729_v19 = vld [vmem:[%s2388_s7 + $0x18] sm:$0xff]  }
  0x6a   :  { %723 = vmatpush2.bf16.msra.mxu0 %v1572_v24  ;;  %958 = vmatpush2.bf16.msra.mxu1 %v1604_v25  ;;  %v1731_v24 = vld [vmem:[%s2388_s7 + $0x10] sm:$0xff]  }
  0x6b   :  { %724 = vmatprep.subr.bf16.mxu0 %v1571_v26  ;;  %959 = vmatprep.subr.bf16.mxu1 %v1603_v27  ;;  %v1012_v25 = vld [vmem:[%s2386_s5 + $0x10] sm:$0xff]  ;;  %v1732_v26 = vld [vmem:[%s2388_s7 + $0x48] sm:$0xff]  }
  0x6c   :  { %v1011_v27 = vld [vmem:[%s2386_s5 + $0x8] sm:$0xff] }
  0x6e   :  { %725 = vmatpush2.bf16.msra.mxu0 %v1570_v32  ;;  %960 = vmatpush2.bf16.msra.mxu1 %v1602_v33  ;;  %v1735_v32 = vld [vmem:[%s2388_s7] sm:$0xff]  }
  0x6f   :  { %726 = vmatprep.subr.bf16.mxu0 %v1569_v34  ;;  %961 = vmatprep.subr.bf16.mxu1 %v1601_v35 }
  0x72   :  { %727 = vmatpush2.bf16.msra.mxu0 %v1568_v39  ;;  %962 = vmatpush2.bf16.msra.mxu1 %v1600_v40 }
  0x73   :  { %728 = vmatprep.subr.bf16.mxu0 %v1567_v41  ;;  %963 = vmatprep.subr.bf16.mxu1 %v1599_v42  ;;  %v1352_v41 = vld [vmem:[%s2390_s9 + $0x38] sm:$0xff]  ;;  %v1351_v42 = vld [vmem:[%s2390_s9 + $0x30] sm:$0xff] }
  0x76   :  { %729 = vmatpush2.bf16.msra.mxu0 %v1566_v47  ;;  %964 = vmatpush2.bf16.msra.mxu1 %v1598_v48  ;;  %v990_v47 = vsub.s32 1, %v985_v44 }
  0x77   :  { %730 = vmatprep.subr.bf16.mxu0 %v1565_v49  ;;  %965 = vmatprep.subr.bf16.mxu1 %v1597_v50 }
  0x7a   :  { %731 = vmatpush2.bf16.msra.mxu0 %v1564_v55  ;;  %966 = vmatpush2.bf16.msra.mxu1 %v1596_v56 }
  0x7b   :  { %732 = vmatprep.subr.bf16.mxu0 %v1563_v58  ;;  %967 = vmatprep.subr.bf16.mxu1 %v1595_v59  ;;  %v991_v58 = vrot.slane %v982_v46, %v990_v47 }
  0x7e   :  { %733 = vmatpush2.bf16.msra.mxu0 %v1562_v0  ;;  %968 = vmatpush2.bf16.msra.mxu1 %v1594_v1 }
  0x7f   :  { %734 = vmatprep.subr.bf16.mxu0 %v1561_v2  ;;  %969 = vmatprep.subr.bf16.mxu1 %v1593_v3 }
  0x82   :  { %735 = vmatpush2.bf16.msra.mxu0 %v1560_v4  ;;  %970 = vmatpush2.bf16.msra.mxu1 %v1592_v5 }
  0x83   :  { %1642 = vmatprep.subr.bf16.mxu0 %v1720_v6  ;;  %1673 = vmatprep.subr.mxu1 %v1766_v13 }
  0x85   :  { %737 = vmatmul.mubr.bf16.vlgmr.msra.gmra.mxu0 %v2052_v12  ;;  %972 = vmatmul.mubr.bf16.vlgmr.msra.gmra.mxu1 %v2052_v12  ;;  %v1724_v12 = vld [vmem:[%s2388_s7 + $0x68] sm:$0xff]  }
  0x86   :  { %1643 = vmatpush3.bf16.msra.mxu0 %v1721_v7  ;;  %1674 = vmatpush3.msra.mxu1 %v1017_v14 }
  0x87   :  { %1644 = vmatprep.subr.bf16.mxu0 %v1722_v8  ;;  %1675 = vmatprep.subr.mxu1 %v1766_v13 }
  0x88   :  { %1676 = vmatpush3.msra.mxu1 %v1016_v16  ;;  %1681 = vmatprep.mubr.msk.f32.mxu1 %vm1767_vm0, %v1766_v13 }
  0x89   :  { %1677 = vmatprep.subr.mxu1 %v1766_v13 }
  0x8a   :  { %1645 = vmatpush3.bf16.msra.mxu0 %v1723_v9  ;;  %1678 = vmatpush3.msra.mxu1 %v1015_v18 }
  0x8b   :  { %1646 = vmatprep.subr.bf16.mxu0 %v1724_v12  ;;  %1679 = vmatprep.subr.mxu1 %v1766_v13 }
  0x8c   :  { %1680 = vmatpush3.msra.mxu1 %v1014_v20  ;;  %v1350_v20 = vld [vmem:[%s2390_s9 + $0x28] sm:$0xff] }
  0x8d   :  { %1684 = vmatprep.subr.mxu1 %v1766_v13  ;;  %1682 = vmatmul.mubr.msk.f32.vlgmr.msra.gmra.mxu1 %vm1018_vm1, %v2289_v22 }
  0x8e   :  { %1647 = vmatpush3.bf16.msra.mxu0 %v1725_v10  ;;  %1685 = vmatpush3.msra.mxu1 %v1013_v23  ;;  %v1348_v23 = vld [vmem:[%s2390_s9 + $0x18] sm:$0xff] }
  0x8f   :  { %1648 = vmatprep.subr.bf16.mxu0 %v1726_v11  ;;  %1686 = vmatprep.subr.mxu1 %v1766_v13 }
  0x90   :  { %1692 = vmatprep.mubr.msk.f32.mxu1 %vm1767_vm0, %v1766_v13  ;;  %1687 = vmatpush3.msra.mxu1 %v1012_v25  ;;  %v1346_v25 = vld [vmem:[%s2390_s9 + $0x8] sm:$0xff] }
  0x91   :  { %1688 = vmatprep.subr.mxu1 %v1766_v13 }
  0x92   :  { %1649 = vmatpush3.bf16.msra.mxu0 %v1727_v15  ;;  %1689 = vmatpush3.msra.mxu1 %v1011_v27 }
  0x93   :  { %1650 = vmatprep.subr.bf16.mxu0 %v1728_v17  ;;  %1690 = vmatprep.subr.mxu1 %v1766_v13 }
  0x94   :  { %1691 = vmatpush3.msra.mxu1 %v1010_v29 }
  0x95   :  { %1693 = vmatmul.mubr.msk.f32.vlgmr.msra.gmra.mxu1 %vm1018_vm1, %v2322_v30  ;;  %1695 = vmatprep.subr.mxu1 %v1766_v13 }
  0x96   :  { %1651 = vmatpush3.bf16.msra.mxu0 %v1729_v19  ;;  %1711 = vmatprep.mubr.msk.f32.mxu1 %vm1767_vm0, %v1766_v13 }
  0x97   :  { %1652 = vmatprep.subr.bf16.mxu0 %v1730_v21  ;;  %1696 = vmatpush3.msra.mxu1 %v1352_v41  ;;  %v1349_v21 = vld [vmem:[%s2390_s9 + $0x20] sm:$0xff] }
  0x98   :  { %1697 = vmatprep.subr.mxu1 %v1766_v13 }
  0x99   :  { %1698 = vmatpush3.msra.mxu1 %v1351_v42 }
  0x9a   :  { %1653 = vmatpush3.bf16.msra.mxu0 %v1731_v24  ;;  %1699 = vmatprep.subr.mxu1 %v1766_v13  ;;  %v1347_v24 = vld [vmem:[%s2390_s9 + $0x10] sm:$0xff] }
  0x9b   :  { %1654 = vmatprep.subr.bf16.mxu0 %v1732_v26  ;;  %1700 = vmatpush3.msra.mxu1 %v1350_v20  ;;  %v1345_v26 = vld [vmem:[%s2390_s9] sm:$0xff] }
  0x9c   :  { %1701 = vmatprep.subr.mxu1 %v1766_v13 }
  0x9d   :  { %1702 = vmatpush3.msra.mxu1 %v1349_v21 }
  0x9e   :  { %1655 = vmatpush3.bf16.msra.mxu0 %v1733_v28  ;;  %1703 = vmatprep.subr.mxu1 %v1766_v13 }
  0x9f   :  { %1656 = vmatprep.subr.bf16.mxu0 %v1734_v31  ;;  %1704 = vmatpush3.msra.mxu1 %v1348_v23  ;;  %v1628_v31 = vld [vmem:[%s2389_s8] ss:$0 sm:$0xff]  ;;  %s1769_s8 = smov 96  }
  0xa0   :  { %1705 = vmatprep.subr.mxu1 %v1766_v13 }
  0xa1   :  { %1706 = vmatpush3.msra.mxu1 %v1347_v24 }
  0xa2   :  { %1657 = vmatpush3.bf16.msra.mxu0 %v1735_v32  ;;  %1707 = vmatprep.subr.mxu1 %v1766_v13 }
  0xa3   :  { %1708 = vmatpush3.msra.mxu1 %v1346_v25 }
  0xa4   :  { %1709 = vmatprep.subr.mxu1 %v1766_v13  ;;  %v1629_v13 = vld [vmem:[%s2391_s10] ss:$0 sm:$0xff]  ;;  %s1771_s10 = smov [#allocation2]  }
  0xa5   :  { %1710 = vmatpush3.msra.mxu1 %v1345_v26  ;;  %s1472_s27 = sshll.u32 %s1771_s10, 4  ;;  %s1473_s27 = int_to_ptr.vmem [resolvable:$true] %s1472_s27 }
  0xa6   :  { %s1744_s28 = scalar_lea.vmem %s1473_s27, 128  ;;  %p1749_p1 = scmp.lt.s32.totalorder %s1473_s27, %s1473_s27 }
  0xa7   :  { %p1745_p0 = scmp.ne.s32.totalorder %s1473_s27, %s1744_s28  ;;  %p1750_p2 = scmp.lt.s32.totalorder %s1744_s28, %s1744_s28 }
  0xa9   :  { %p1751_p3 = por %p1750_p2, %p1749_p1 }
  0xab   :  { %p1752_p4 = pnand %p1751_p3, %p1745_p0 }
 0x105   :  { %v270_v33 = vpop.f32.mrf.mxu0  ;;  %v503_v34 = vpop.f32.mrf.mxu1 }
 0x106   :  { %v510_v35 = vmax.f32 %v270_v33, %v503_v34 }
 0x107   :  { %v272_v36 = vpop.f32.mrf.mxu0  ;;  %v505_v57 = vpop.f32.mrf.mxu1 }
 0x108   :  { %v511_v49 = vmax.f32 %v272_v36, %v505_v57 }
 0x109   :  { %v274_v37 = vpop.f32.mrf.mxu0  ;;  %v507_v38 = vpop.f32.mrf.mxu1 }
 0x10b   :  { %v275_v39 = vpop.f32.mrf.mxu0  ;;  %v508_v40 = vpop.f32.mrf.mxu1 }
 0x10c   :  { %v1441_v40 = vpop.permute.xlu0 %1440 }
 0x110   :  { %v1446_v42 = vpop.permute.xlu0 %1445 }
 0x145   :  { %v738_v48 = vpop.f32.mrf.mxu0  ;;  %v973_v51 = vpop.f32.mrf.mxu1 }
 0x146   :  { %v745_v50 = vmax.f32 %v510_v35, %v738_v48 }
 0x147   :  { %v740_v53 = vpop.f32.mrf.mxu0  ;;  %v975_v56 = vpop.f32.mrf.mxu1 }
 0x148   :  { %v980_v54 = vmax.f32 %v745_v50, %v973_v51  ;;  %v746_v55 = vmax.f32 %v511_v49, %v740_v53 }
 0x149   :  { %v742_v59 = vpop.f32.mrf.mxu0  ;;  %v977_v62 = vpop.f32.mrf.mxu1 }
 0x14a   :  { %v994_v60 = vadd.f32 %v987_v52, %v980_v54  ;;  %v981_v61 = vmax.f32 %v746_v55, %v975_v56 }
 0x14b   :  { %v743_v63 = vpop.f32.mrf.mxu0  ;;  %v978_v2 = vpop.f32.mrf.mxu1 }
 0x14c   :  { %v998_v0 = vmin.f32 %v994_v60, 0.0  ;;  %v995_v1 = vadd.f32 %v991_v58, %v981_v61  ;;  %vm996_vm2 = vcmp.gt.f32.partialorder %v994_v60, 0.0 }
 0x14d   :  { %v1088_v15 = vpop.f32.mrf.mxu1 }
 0x14e   :  { %v1000_v3 = vmul.f32 1.442695, %v998_v0  ;;  %v999_v4 = vmin.f32 %v995_v1, 0.0  ;;  %vm997_vm3 = vcmp.gt.f32.partialorder %v995_v1, 0.0 }
 0x14f   :  { %v1683_v16 = vpop.f32.mrf.mxu1 }
 0x150   :  { %1736 = vpow2.f32 %v1000_v3  ;;  %v1002_v5 = vmul.f32 1.442695, %v999_v4 }
 0x152   :  { %1738 = vpow2.f32 %v1002_v5 }
 0x155   :  { %v1161_v17 = vpop.f32.mrf.mxu1 }
 0x156   :  { %v1162_v18 = vadd.f32 %v1161_v17, %v1088_v15 }
 0x157   :  { %v1694_v19 = vpop.f32.mrf.mxu1 }
 0x15d   :  { %v1737_v6 = vpop.eup %1736 }
 0x15e   :  { %v1608_v7 = vadd.f32 -1.0, %v1737_v6 }
 0x15f   :  { %v1739_v8 = vpop.eup %1738 }
 0x160   :  { %v1609_v9 = vadd.f32 -1.0, %v1739_v8  ;;  %v1006_v12 = vsel %vm996_vm2, %v994_v60, %v1608_v7 }
 0x161   :  { %v1165_v14 = vpack.c.bf16 %v1006_v12, %v1006_v12 }
 0x162   :  { %v1007_v10 = vsel %vm997_vm3, %v995_v1, %v1609_v9 }
 0x163   :  { %v1166_v11 = vpack.c.bf16 %v1007_v10, %v1007_v10 }
 0x165   :  { %1327 = vmatprep.mubr.bf16.mxu0 %v1166_v11 }
 0x166   :  { %1328 = vmatmul.mubr.bf16.vlgmr.msra.gmra.mxu0 %v1165_v14 }
 0x226   :  { %v1658_v27 = vpop.f32.mrf.mxu0 }
 0x228   :  { %v1659_v28 = vpop.f32.mrf.mxu0 }
 0x229   :  { %v1660_v29 = vadd.f32 %v1659_v28, %v1658_v27 }
 0x22a   :  { %v1661_v32 = vpop.f32.mrf.mxu0 }
 0x22b   :  { %v1335_v33 = vadd.f32 %v1660_v29, %v1162_v18 }
 0x22c   :  { %v1662_v34 = vpop.f32.mrf.mxu0 }
 0x22d   :  { %v1343_v35 = vadd.f32 %v1628_v31, %v1335_v33 }
 0x22f   :  { %v1344_v36 = vmax.f32 %v1343_v35, 0.0 }
 0x231   :  { %1712 = vmatmul.mubr.msk.f32.vlgmr.msra.gmra.mxu1 %vm1360_vm4, %v1344_v36 }
 0x2f1   :  { %v1430_v30 = vpop.f32.mrf.mxu1 }
 0x2f2   :  { %v1431_v22 = vadd.f32 %v1629_v13, %v1430_v30 }
 0x2f3   :  { %v1713_v57 = vpop.f32.mrf.mxu1 }
 0x2f4   :  { %v1631_v37 = vmul.f32 -1.442695, %v1431_v22 }
 0x2f6   :  { %1740 = vpow2.f32 %v1631_v37 }
 0x303   :  { %v1741_v38 = vpop.eup %1740 }
 0x304   :  { %v1437_v39 = vadd.f32 1.0, %v1741_v38 }
 0x306   :  { %1742 = vrcp.f32 %v1437_v39 }
 0x313   :  { %v1743_v41 = vpop.eup %1742 }
 0x314   :  { %v1444_v43 = vsub.f32 1.0, %v1743_v41  ;;  %v1443_v44 = vmul.f32 %v1743_v41, %v1441_v40 }
 0x316   :  { %v1448_v45 = vmul.f32 %v1446_v42, %v1444_v43 }
 0x318   :  { %v1449_v46 = vadd.f32 %v1448_v45, %v1443_v44 }
 0x31a   :  { %1451 = vrot.lane.b32.xlu1 %v1449_v46, %s1769_s8 }
 0x31e   :  { %1456 = vrot.lane.b32.xlu1 %v1431_v22, %s1770_s26 }
 0x38c   :  { %v1452_v47 = vpop.permute.xlu1 %1451 }
 0x38d   :  { %v1454_v49 = vmul.f32 %v1743_v41, %v1452_v47 }
 0x390   :  { %v1457_v48 = vpop.permute.xlu1 %1456 }
 0x391   :  { %v1459_v50 = vmul.f32 %v1457_v48, %v1444_v43 }
 0x393   :  { %v1460_v51 = vadd.f32 %v1459_v50, %v1454_v49 }
 0x395   :  { %1462 = vrot.lane.b32.xlu0 %v1460_v51, %s1769_s8 }
 0x407   :  { %v1463_v52 = vpop.permute.xlu0 %1462 }
 0x408   :  { %1465 = vst.msk [vmem:[#allocation2] sm:$0xff] %vm1018_vm1, %v1463_v52 }
 0x409   :  { %1755 = shalt.err (!%p1752_p4)
}
 0x40a   :  { %1475 = dma.vmem_to_hbm [thread:$0]  %s1473_s27, 128, %s2392_s11, [#allocation3]  }
 0x40b   :  { %1764 = dma.done.wait [#allocation3], 128  }
 0x40c   :  { %1765 = vsyncadd [#allocation3], 4294967168 }
 0x40d   :  { %1479 = vsyncpa [#allocation3], 1 }

</bundles_post_ra>
